<compile_context>
chip_gen: v5e
topology: v5e:2x2
jax: 0.10.0
libtpu: 0.0.40
codegen_flags: <defaults>
</compile_context>

<pallas_src>
import jax
import jax.numpy as jnp
from jax.experimental import pallas as pl
from jax.experimental.pallas import tpu as pltpu


_LANE = 128
_MXU_ROWS = 256     # v6e/v7x MXU is 2x256x256 -> 256-aligned row tiles keep it full
_SUBLANE = 8


def film_kernel(x_ref, cond_ref, w_ref, b_ref, o_ref):
    """out = gamma * x + beta, with [gamma | beta] = cond @ W_cat + b_cat."""
    d = x_ref.shape[-1]
    cond = cond_ref[...].astype(w_ref.dtype)       # in-kernel cast: no wrapper HBM pass
    y = jnp.dot(cond, w_ref[...], preferred_element_type=jnp.float32)
    y = y + b_ref[...]                             # single (1, 2D) bias add
    gamma = y[:, :d]                               # lane slices (free when D % 128 == 0)
    beta = y[:, d:]
    o_ref[...] = (gamma * x_ref[...].astype(jnp.float32) + beta).astype(o_ref.dtype)


def prepare_film_params(weight, bias, matmul_dtype=jnp.bfloat16):
    """Fuse/transpose the nn.Linear(d, 2d) params ONCE at parameter-load time.

    weight: (2D, D) (torch layout), bias: (2D,).
    Returns w_cat: (D, 2D) in `matmul_dtype`, b_cat: (1, 2D) f32.
    """
    two_d, d = weight.shape
    assert two_d == 2 * d, "expected nn.Linear(d_model, 2*d_model) weight (2D, D)"
    w_cat = jnp.asarray(weight).T.astype(matmul_dtype)
    b_cat = jnp.asarray(bias).reshape(1, two_d).astype(jnp.float32)
    return w_cat, b_cat


def _round_down(x, m):
    return (x // m) * m


def _vmem_capacity_bytes():
    try:
        return int(pltpu.get_tpu_info().vmem_capacity_bytes)
    except Exception:
        return 128 * 1024 * 1024      # v5e / v6e default


def _vmem_budgets():
    cap = _vmem_capacity_bytes()
    # Never request the full physical VMEM: leave headroom for Mosaic internal
    # scratch (v7x: 64 MiB physical, v5e/v6e: 128 MiB).
    limit = min(int(cap * 0.85), cap - (8 << 20))
    tile_budget = int(limit * 0.80)
    return limit, tile_budget


def _default_row_tile(m, d, x_itemsize, weight_bytes, tile_budget):
    """Largest row tile whose streamed + resident VMEM fits `tile_budget`."""
    # Streamed, double-buffered x / cond / out rows, plus in-kernel temporaries:
    # (tm, 2D) f32 matmul result (8D B/row), (tm, D) bf16 cond cast (2D B/row),
    # and slack for the gamma*x+beta intermediates (4D B/row).
    per_row = 3 * 2 * x_itemsize * d + 8 * d + 2 * d + 4 * d
    avail = tile_budget - weight_bytes
    if avail < per_row * _SUBLANE:
        # TODO(synk): route to a K/N-tiled weight kernel for very large D.
        raise ValueError(
            f"FiLM fused weight ({weight_bytes / 2**20:.1f} MiB) leaves no room for "
            f"row tiles inside the {tile_budget / 2**20:.1f} MiB VMEM tile budget "
            f"(D={d}); a weight-tiled kernel is required.")
    tm = avail // per_row
    tm = min(tm, 4096)                     # per-step overhead already well amortized
    if tm >= _MXU_ROWS:
        tm = _round_down(tm, _MXU_ROWS)    # keep the 256x256 systolic array full
    else:
        tm = max(_SUBLANE, _round_down(tm, _SUBLANE))
    return min(tm, m)


def film_pallas(x, conditioning, w_cat, b_cat, *, row_tile=None, min_grid_steps=4):
    """FiLM forward. x, conditioning: (..., D).  w_cat/b_cat from prepare_film_params."""
    orig_shape = x.shape
    D = orig_shape[-1]
    M = 1
    for s in orig_shape[:-1]:
        M *= s
    x2 = x.reshape(M, D)
    c2 = conditioning.reshape(M, D)
    assert w_cat.shape == (D, 2 * D) and b_cat.shape == (1, 2 * D)

    vmem_limit, tile_budget = _vmem_budgets()
    weight_bytes = (w_cat.size * w_cat.dtype.itemsize
                    + b_cat.size * b_cat.dtype.itemsize)

    if row_tile is None:
        tm = _default_row_tile(M, D, x2.dtype.itemsize, weight_bytes, tile_budget)
        # Guarantee >= min_grid_steps grid steps when M allows MXU-aligned tiles
        # so DMA/compute overlap engages and each v7x TensorCore gets >= 2 tiles.
        if M >= min_grid_steps * _MXU_ROWS:
            cap = max(_MXU_ROWS, _round_down(pl.cdiv(M, min_grid_steps), _MXU_ROWS))
            tm = min(tm, cap)
    else:
        tm = min(int(row_tile), M)

    if tm < M:
        tm = max(_SUBLANE, _round_down(tm, _SUBLANE))   # block rows: sublane multiple
    else:
        tm = M                                          # single full block (tiny shapes)
    grid = (pl.cdiv(M, tm),)

    def build(weight_pipeline_mode):
        w_kwargs = ({} if weight_pipeline_mode is None
                    else dict(pipeline_mode=weight_pipeline_mode))
        return pl.pallas_call(
            film_kernel,
            out_shape=jax.ShapeDtypeStruct((M, D), x.dtype),
            grid_spec=pltpu.PrefetchScalarGridSpec(
                num_scalar_prefetch=0,
                grid=grid,
                in_specs=[
                    pl.BlockSpec((tm, D), lambda i: (i, 0)),   # x rows (streamed)
                    pl.BlockSpec((tm, D), lambda i: (i, 0)),   # cond rows (streamed)
                    pl.BlockSpec((D, 2 * D), lambda i: (0, 0), **w_kwargs),  # fused W
                    pl.BlockSpec((1, 2 * D), lambda i: (0, 0), **w_kwargs),  # fused bias
                ],
                out_specs=pl.BlockSpec((tm, D), lambda i: (i, 0)),
            ),
            compiler_params=pltpu.CompilerParams(
                dimension_semantics=("parallel",),   # independent rows -> megacore split
                vmem_limit_bytes=vmem_limit,
            ),
        )

    try:
        # Grid-invariant operands are single-buffered: DMA'd once, one VMEM copy.
        out2 = build(pl.Buffered(1))(x2, c2, w_cat, b_cat)
    except Exception:
        # Fallback for jax versions without pipeline_mode / Buffered(1) support:
        # default 2-deep buffering (slightly more VMEM, identical result).
        out2 = build(None)(x2, c2, w_cat, b_cat)

    return out2.reshape(orig_shape)


def film_reference(x, conditioning, weight, bias):
    y = conditioning @ weight.T + bias
    D = x.shape[-1]
    gamma, beta = y[..., :D], y[..., D:]
    return gamma * x + beta


if __name__ == "__main__":
    key = jax.random.PRNGKey(0)
    kx, kc, kw, kb = jax.random.split(key, 4)

    # ---- small shape consistent with the module (d_model = 32) -------------
    B, T, D = 2, 8, 32
    x = jax.random.normal(kx, (B, T, D), dtype=jnp.float32)
    cond = jax.random.normal(kc, (B, T, D), dtype=jnp.float32)
    bound = 1.0 / float(D) ** 0.5
    weight = jax.random.uniform(kw, (2 * D, D), minval=-bound, maxval=bound,
                                dtype=jnp.float32)
    bias = jax.random.uniform(kb, (2 * D,), minval=-bound, maxval=bound,
                              dtype=jnp.float32)

    # Default bf16-matmul path (full-rate MXU on v5e/v6e/v7x).
    w_bf16, b_cat = prepare_film_params(weight, bias, matmul_dtype=jnp.bfloat16)
    out = jax.block_until_ready(film_pallas(x, cond, w_bf16, b_cat))
    assert out.shape == (B, T, D)
    ref_bf16 = film_reference(
        x, cond.astype(jnp.bfloat16).astype(jnp.float32),
        weight.astype(jnp.bfloat16).astype(jnp.float32), bias)
    assert jnp.allclose(out, ref_bf16, atol=1e-4, rtol=1e-4), "bf16 path mismatch"
    ref_f32 = film_reference(x, cond, weight, bias)
    assert jnp.allclose(out, ref_f32, atol=1e-1, rtol=1e-1), "bf16 path drifted from f32"

    # Exact-precision path (f32 MXU) for strict parity with the PyTorch Linear.
    # (Tolerance covers differing f32-matmul pass counts between XLA and Mosaic.)
    w_f32, b_cat32 = prepare_film_params(weight, bias, matmul_dtype=jnp.float32)
    out32 = jax.block_until_ready(film_pallas(x, cond, w_f32, b_cat32))
    assert jnp.allclose(out32, ref_f32, atol=1e-2, rtol=1e-2), "f32 path mismatch"

    # ---- production-layout check: D % 128 == 0, multi-step pipelined grid --
    # M = 520 rows, row_tile = 256 -> grid = (3,), partial last block (8 rows).
    B2, T2, D2 = 2, 260, 128
    kx2, kc2, kw2, kb2 = jax.random.split(jax.random.PRNGKey(1), 4)
    x_b = jax.random.normal(kx2, (B2, T2, D2), dtype=jnp.float32)
    c_b = jax.random.normal(kc2, (B2, T2, D2), dtype=jnp.float32)
    bound2 = 1.0 / float(D2) ** 0.5
    w_b = jax.random.uniform(kw2, (2 * D2, D2), minval=-bound2, maxval=bound2,
                             dtype=jnp.float32)
    b_b = jax.random.uniform(kb2, (2 * D2,), minval=-bound2, maxval=bound2,
                             dtype=jnp.float32)
    w_b_cat, b_b_cat = prepare_film_params(w_b, b_b)
    out_b = jax.block_until_ready(film_pallas(x_b, c_b, w_b_cat, b_b_cat, row_tile=256))
    ref_b = film_reference(
        x_b, c_b.astype(jnp.bfloat16).astype(jnp.float32),
        w_b.astype(jnp.bfloat16).astype(jnp.float32), b_b)
    assert jnp.allclose(out_b, ref_b, atol=2e-4, rtol=2e-4), "tiled path mismatch"

    print("KERNEL_OK")
</pallas_src>

<mosaic_0001>
module attributes {stable_mosaic.version = 11 : i64} {
  func.func @film_kernel(%arg0: i32, %arg1: memref<16x32xf32, #tpu.memory_space<vmem>>, %arg2: memref<16x32xf32, #tpu.memory_space<vmem>>, %arg3: memref<32x64xbf16, #tpu.memory_space<vmem>>, %arg4: memref<1x64xf32, #tpu.memory_space<vmem>>, %arg5: memref<16x32xf32, #tpu.memory_space<vmem>>) attributes {dimension_semantics = [#tpu.dimension_semantics<parallel>], iteration_bounds = array<i64: 1>, scalar_prefetch = 0 : i64, scratch_operands = 0 : i64, tpu.core_type = #tpu.core_type<tc>, window_params = [{transform_indices = @transform_0, window_bounds = array<i64: 16, 32>}, {transform_indices = @transform_1, window_bounds = array<i64: 16, 32>}, {pipeline_mode = #tpu.pipeline_mode<synchronous>, transform_indices = @transform_2, window_bounds = array<i64: 32, 64>}, {pipeline_mode = #tpu.pipeline_mode<synchronous>, transform_indices = @transform_3, window_bounds = array<i64: 1, 64>}, {transform_indices = @transform_4, window_bounds = array<i64: 16, 32>}]} {
    %c0 = arith.constant 0 : index
    %c0_0 = arith.constant 0 : index
    %0 = vector.load %arg2[%c0, %c0_0] : memref<16x32xf32, #tpu.memory_space<vmem>>, vector<16x32xf32>
    %1 = arith.truncf %0 : vector<16x32xf32> to vector<16x32xbf16>
    %c0_1 = arith.constant 0 : index
    %c0_2 = arith.constant 0 : index
    %2 = vector.load %arg3[%c0_1, %c0_2] : memref<32x64xbf16, #tpu.memory_space<vmem>>, vector<32x64xbf16>
    %cst = arith.constant dense<0.000000e+00> : vector<16x64xf32>
    %3 = tpu.matmul %1, %2, %cst {dimension_numbers = #tpu.dot_dimension_numbers<[1], [0], [0], [1], [0, 0, 1, 1], [], []>} : vector<16x32xbf16>, vector<32x64xbf16>, vector<16x64xf32> -> vector<16x64xf32>
    %c0_3 = arith.constant 0 : index
    %c0_4 = arith.constant 0 : index
    %4 = vector.load %arg4[%c0_3, %c0_4] : memref<1x64xf32, #tpu.memory_space<vmem>>, vector<1x64xf32>
    %5 = vector.broadcast %4 : vector<1x64xf32> to vector<16x64xf32>
    %6 = arith.addf %3, %5 : vector<16x64xf32>
    %7 = vector.extract_strided_slice %6 {offsets = [0, 0], sizes = [16, 32], strides = [1, 1]} : vector<16x64xf32> to vector<16x32xf32>
    %8 = vector.extract_strided_slice %6 {offsets = [0, 32], sizes = [16, 32], strides = [1, 1]} : vector<16x64xf32> to vector<16x32xf32>
    %c0_5 = arith.constant 0 : index
    %c0_6 = arith.constant 0 : index
    %9 = vector.load %arg1[%c0_5, %c0_6] : memref<16x32xf32, #tpu.memory_space<vmem>>, vector<16x32xf32>
    %10 = arith.mulf %7, %9 : vector<16x32xf32>
    %11 = arith.addf %10, %8 : vector<16x32xf32>
    %c0_7 = arith.constant 0 : index
    %c0_8 = arith.constant 0 : index
    %12 = vector.load %arg5[%c0_7, %c0_8] : memref<16x32xf32, #tpu.memory_space<vmem>>, vector<16x32xf32>
    tpu.vector_store %arg5[%c0_7, %c0_8], %11 {strides = array<i32>} : memref<16x32xf32, #tpu.memory_space<vmem>>, vector<16x32xf32>,
    return
  }
  func.func @transform_0(%arg0: i32) -> (i32, i32) {
    %c0_i32 = arith.constant 0 : i32
    %c0_i32_0 = arith.constant 0 : i32
    return %arg0, %c0_i32 : i32, i32
  }
  func.func @transform_1(%arg0: i32) -> (i32, i32) {
    %c0_i32 = arith.constant 0 : i32
    %c0_i32_0 = arith.constant 0 : i32
    return %arg0, %c0_i32 : i32, i32
  }
  func.func @transform_2(%arg0: i32) -> (i32, i32) {
    %c0_i32 = arith.constant 0 : i32
    %c0_i32_0 = arith.constant 0 : i32
    %c0_i32_1 = arith.constant 0 : i32
    return %c0_i32, %c0_i32_0 : i32, i32
  }
  func.func @transform_3(%arg0: i32) -> (i32, i32) {
    %c0_i32 = arith.constant 0 : i32
    %c0_i32_0 = arith.constant 0 : i32
    %c0_i32_1 = arith.constant 0 : i32
    return %c0_i32, %c0_i32_0 : i32, i32
  }
  func.func @transform_4(%arg0: i32) -> (i32, i32) {
    %c0_i32 = arith.constant 0 : i32
    %c0_i32_0 = arith.constant 0 : i32
    return %arg0, %c0_i32 : i32, i32
  }
}

module attributes {stable_mosaic.version = 11 : i64} {
  func.func @film_kernel(%arg0: i32, %arg1: memref<16x32xf32, #tpu.memory_space<vmem>>, %arg2: memref<16x32xf32, #tpu.memory_space<vmem>>, %arg3: memref<32x64xbf16, #tpu.memory_space<vmem>>, %arg4: memref<1x64xf32, #tpu.memory_space<vmem>>, %arg5: memref<16x32xf32, #tpu.memory_space<vmem>>) attributes {dimension_semantics = [#tpu.dimension_semantics<parallel>], iteration_bounds = array<i64: 1>, scalar_prefetch = 0 : i64, scratch_operands = 0 : i64, tpu.core_type = #tpu.core_type<tc>, window_params = [{transform_indices = @transform_0, window_bounds = array<i64: 16, 32>}, {transform_indices = @transform_1, window_bounds = array<i64: 16, 32>}, {pipeline_mode = #tpu.pipeline_mode<synchronous>, transform_indices = @transform_2, window_bounds = array<i64: 32, 64>}, {pipeline_mode = #tpu.pipeline_mode<synchronous>, transform_indices = @transform_3, window_bounds = array<i64: 1, 64>}, {transform_indices = @transform_4, window_bounds = array<i64: 16, 32>}]} {
    %c0 = arith.constant 0 : index
    %c0_0 = arith.constant 0 : index
    %0 = vector.load %arg2[%c0, %c0_0] : memref<16x32xf32, #tpu.memory_space<vmem>>, vector<16x32xf32>
    %1 = arith.truncf %0 : vector<16x32xf32> to vector<16x32xbf16>
    %c0_1 = arith.constant 0 : index
    %c0_2 = arith.constant 0 : index
    %2 = vector.load %arg3[%c0_1, %c0_2] : memref<32x64xbf16, #tpu.memory_space<vmem>>, vector<32x64xbf16>
    %cst = arith.constant dense<0.000000e+00> : vector<16x64xf32>
    %3 = tpu.matmul %1, %2, %cst {dimension_numbers = #tpu.dot_dimension_numbers<[1], [0], [0], [1], [0, 0, 1, 1], [], []>} : vector<16x32xbf16>, vector<32x64xbf16>, vector<16x64xf32> -> vector<16x64xf32>
    %c0_3 = arith.constant 0 : index
    %c0_4 = arith.constant 0 : index
    %4 = vector.load %arg4[%c0_3, %c0_4] : memref<1x64xf32, #tpu.memory_space<vmem>>, vector<1x64xf32>
    %5 = vector.broadcast %4 : vector<1x64xf32> to vector<16x64xf32>
    %6 = arith.addf %3, %5 : vector<16x64xf32>
    %7 = vector.extract_strided_slice %6 {offsets = [0, 0], sizes = [16, 32], strides = [1, 1]} : vector<16x64xf32> to vector<16x32xf32>
    %8 = vector.extract_strided_slice %6 {offsets = [0, 32], sizes = [16, 32], strides = [1, 1]} : vector<16x64xf32> to vector<16x32xf32>
    %c0_5 = arith.constant 0 : index
    %c0_6 = arith.constant 0 : index
    %9 = vector.load %arg1[%c0_5, %c0_6] : memref<16x32xf32, #tpu.memory_space<vmem>>, vector<16x32xf32>
    %10 = arith.mulf %7, %9 : vector<16x32xf32>
    %11 = arith.addf %10, %8 : vector<16x32xf32>
    %c0_7 = arith.constant 0 : index
    %c0_8 = arith.constant 0 : index
    %12 = vector.load %arg5[%c0_7, %c0_8] : memref<16x32xf32, #tpu.memory_space<vmem>>, vector<16x32xf32>
    tpu.vector_store %arg5[%c0_7, %c0_8], %11 {strides = array<i32>} : memref<16x32xf32, #tpu.memory_space<vmem>>, vector<16x32xf32>,
    return
  }
  func.func @transform_0(%arg0: i32) -> (i32, i32) {
    %c0_i32 = arith.constant 0 : i32
    %c0_i32_0 = arith.constant 0 : i32
    return %arg0, %c0_i32 : i32, i32
  }
  func.func @transform_1(%arg0: i32) -> (i32, i32) {
    %c0_i32 = arith.constant 0 : i32
    %c0_i32_0 = arith.constant 0 : i32
    return %arg0, %c0_i32 : i32, i32
  }
  func.func @transform_2(%arg0: i32) -> (i32, i32) {
    %c0_i32 = arith.constant 0 : i32
    %c0_i32_0 = arith.constant 0 : i32
    %c0_i32_1 = arith.constant 0 : i32
    return %c0_i32, %c0_i32_0 : i32, i32
  }
  func.func @transform_3(%arg0: i32) -> (i32, i32) {
    %c0_i32 = arith.constant 0 : i32
    %c0_i32_0 = arith.constant 0 : i32
    %c0_i32_1 = arith.constant 0 : i32
    return %c0_i32, %c0_i32_0 : i32, i32
  }
  func.func @transform_4(%arg0: i32) -> (i32, i32) {
    %c0_i32 = arith.constant 0 : i32
    %c0_i32_0 = arith.constant 0 : i32
    return %arg0, %c0_i32 : i32, i32
  }
}

</mosaic_0001>

<bundles_post_ra>
// kernel: tpu_custom_call.1
= control target key start
LH: loop header
LB: loop body
LE: loop exit
PB: predicated region body
PF: predicated region fallthrough
CT: control target
= control target key end

     0   :  { %9 = vsyncpa [#allocation3], 0  ;;  %s327_s0 = inlined_call_operand.hbm [shape: f32[16,32], index: 0, kind: input, shape index: {}]   ;;  %s328_s1 = inlined_call_operand.hbm [shape: f32[16,32], index: 1, kind: input, shape index: {}]   ;;  %s329_s2 = inlined_call_operand.hbm [shape: bf16[32,64], index: 2, kind: input, shape index: {}]   ;;  %s330_s3 = inlined_call_operand.vmem [shape: f32[1,64], index: 3, kind: input, shape index: {}]   ;;  %s331_s4 = inlined_call_operand.hbm [shape: f32[16,32], index: 4, kind: output, shape index: {}]  }
   0x1   :  { %10 = vsyncpa [#allocation6], 0 }
   0x2   :  { %11 = vsyncpa [#allocation4], 0  ;;  %s29_s17 = sshll.u32 %s328_s1, 4  ;;  %s266_s18 = smov [#allocation5]   ;;  %s30_s17 = int_to_ptr.hbm [resolvable:$true] %s29_s17 }
   0x3   :  { %s31_s19 = sshll.u32 %s266_s18, 4  ;;  %s16_s22 = sshll.u32 %s327_s0, 4  ;;  %s32_s19 = int_to_ptr.vmem [resolvable:$true] %s31_s19  ;;  %s17_s22 = int_to_ptr.hbm [resolvable:$true] %s16_s22 }
   0x4   :  { %s267_s23 = smov 128   ;;  %s268_s24 = smov 8  }
   0x5   :  { %37 = dma.hbm_to_vmem [thread:$0]  %s30_s17, 256, %s32_s19, [#allocation6], %s267_s23, %s267_s23, %s268_s24  }
   0x6   :  { %s269_s25 = smov [#allocation2]   ;;  %s42_s1 = sshll.u32 %s329_s2, 4  ;;  %s43_s1 = int_to_ptr.hbm [resolvable:$true] %s42_s1 }
   0x7   :  { %s18_s26 = sshll.u32 %s269_s25, 4  ;;  %s270_s0 = smov [#allocation7]   ;;  %s19_s26 = int_to_ptr.vmem [resolvable:$true] %s18_s26 }
   0x8   :  { %24 = dma.hbm_to_vmem [thread:$0]  %s17_s22, 256, %s19_s26, [#allocation3], %s267_s23, %s267_s23, %s268_s24  }
   0x9   :  { %s44_s29 = sshll.u32 %s270_s0, 4  ;;  %s271_s30 = smov 64   ;;  %s45_s29 = int_to_ptr.vmem [resolvable:$true] %s44_s29 }
   0xa   :  { %s272_s5 = smov 4  }
   0xb   :  { %50 = dma.hbm_to_vmem [thread:$0]  %s43_s1, 256, %s45_s29, [#allocation6], %s271_s30, %s271_s30, %s272_s5  }
   0xc   :  { %260 = dma.done.wait [#allocation3], 256  }
   0xd   :  { %261 = vsyncadd [#allocation3], 4294967040 }
   0xe   :  { %262 = dma.done.wait [#allocation6], 512  }
   0xf   :  { %263 = vsyncadd [#allocation6], 4294966784  ;;  %v153_v0 = vld [vmem:[#allocation7 + $0x8] sm:$0xff]  ;;  %v152_v1 = vld [vmem:[#allocation7] sm:$0xff]  ;;  %vm89_vm0 = vcmask 261120   ;;  %s273_s7 = smov 96  }
  0x10   :  { %99 = vmatpush.bf16.msra.mxu0 %v153_v0  ;;  %v66_v2 = vld [vmem:[#allocation5] sm:$0xff]  ;;  %v67_v3 = vld [vmem:[#allocation5 + $0x8] sm:$0xff]  ;;  %v163_v5 = vld [vmem:[%s330_s3] ss:$0 sm:$0xff]  ;;  %s274_s8 = smov [#allocation8]   ;;  %s129_s3 = sshll.u32 %s331_s4, 4  ;;  %s130_s3 = int_to_ptr.hbm [resolvable:$true] %s129_s3 }
  0x11   :  { %v68_v4 = vpack.c.bf16 %v67_v3, %v66_v2  ;;  %v107_v10 = vld [vmem:[#allocation2] sm:$0xff]  ;;  %v108_v14 = vld [vmem:[#allocation2 + $0x8] sm:$0xff]  ;;  %s127_s9 = sshll.u32 %s274_s8, 4  ;;  %s128_s9 = int_to_ptr.vmem [resolvable:$true] %s127_s9 }
  0x14   :  { %100 = vmatpush.bf16.msra.mxu0 %v152_v1 }
  0x17   :  { %151 = vmatmul.msk.bf16.vlgmr.msra.gmra.mxu0 %vm89_vm0, %v68_v4 }
  0x94   :  { %v102_v6 = vpop.f32.mrf.mxu0 }
  0x95   :  { %v103_v7 = vadd.f32 %v163_v5, %v102_v6 }
  0x97   :  { %113 = vrot.lane.b32.xlu0 %v103_v7, %s273_s7  ;;  %v109_v11 = vmul.f32 %v107_v10, %v103_v7 }
  0x9c   :  { %v104_v8 = vpop.f32.mrf.mxu0 }
  0x9d   :  { %v105_v9 = vadd.f32 %v163_v5, %v104_v8 }
  0x9f   :  { %115 = vrot.lane.b32.xlu0 %v105_v9, %s273_s7  ;;  %v110_v15 = vmul.f32 %v108_v14, %v105_v9 }
 0x109   :  { %v114_v12 = vpop.permute.xlu0 %113 }
 0x10a   :  { %v119_v13 = vadd.f32 %v114_v12, %v109_v11 }
 0x10c   :  { %121 = vst.msk [vmem:[#allocation8] sm:$0xff] %vm89_vm0, %v119_v13 }
 0x111   :  { %v116_v16 = vpop.permute.xlu0 %115 }
 0x112   :  { %v120_v17 = vadd.f32 %v116_v16, %v110_v15 }
 0x114   :  { %122 = vst.msk [vmem:[#allocation8 + $0x8] sm:$0xff] %vm89_vm0, %v120_v17 }
 0x115   :  { %135 = dma.vmem_to_hbm [thread:$0]  %s128_s9, 256, %s130_s3, [#allocation4], %s267_s23, %s267_s23, %s268_s24  }
 0x116   :  { %264 = dma.done.wait [#allocation4], 256  }
 0x117   :  { %265 = vsyncadd [#allocation4], 4294967040 }
 0x118   :  { %140 = vsyncpa [#allocation3], 1 }
 0x119   :  { %141 = vsyncpa [#allocation6], 1 }
 0x11a   :  { %142 = vsyncpa [#allocation4], 1 }

// kernel: tpu_custom_call.1
= control target key start
LH: loop header
LB: loop body
LE: loop exit
PB: predicated region body
PF: predicated region fallthrough
CT: control target
= control target key end

     0   :  { %9 = vsyncpa [#allocation3], 0  ;;  %s327_s0 = inlined_call_operand.hbm [shape: f32[16,32], index: 0, kind: input, shape index: {}]   ;;  %s328_s1 = inlined_call_operand.hbm [shape: f32[16,32], index: 1, kind: input, shape index: {}]   ;;  %s329_s2 = inlined_call_operand.hbm [shape: bf16[32,64], index: 2, kind: input, shape index: {}]   ;;  %s330_s3 = inlined_call_operand.vmem [shape: f32[1,64], index: 3, kind: input, shape index: {}]   ;;  %s331_s4 = inlined_call_operand.hbm [shape: f32[16,32], index: 4, kind: output, shape index: {}]  }
   0x1   :  { %10 = vsyncpa [#allocation6], 0 }
   0x2   :  { %11 = vsyncpa [#allocation4], 0  ;;  %s29_s17 = sshll.u32 %s328_s1, 4  ;;  %s266_s18 = smov [#allocation5]   ;;  %s30_s17 = int_to_ptr.hbm [resolvable:$true] %s29_s17 }
   0x3   :  { %s31_s19 = sshll.u32 %s266_s18, 4  ;;  %s16_s22 = sshll.u32 %s327_s0, 4  ;;  %s32_s19 = int_to_ptr.vmem [resolvable:$true] %s31_s19  ;;  %s17_s22 = int_to_ptr.hbm [resolvable:$true] %s16_s22 }
   0x4   :  { %s267_s23 = smov 128   ;;  %s268_s24 = smov 8  }
   0x5   :  { %37 = dma.hbm_to_vmem [thread:$0]  %s30_s17, 256, %s32_s19, [#allocation6], %s267_s23, %s267_s23, %s268_s24  }
   0x6   :  { %s269_s25 = smov [#allocation2]   ;;  %s42_s1 = sshll.u32 %s329_s2, 4  ;;  %s43_s1 = int_to_ptr.hbm [resolvable:$true] %s42_s1 }
   0x7   :  { %s18_s26 = sshll.u32 %s269_s25, 4  ;;  %s270_s0 = smov [#allocation7]   ;;  %s19_s26 = int_to_ptr.vmem [resolvable:$true] %s18_s26 }
   0x8   :  { %24 = dma.hbm_to_vmem [thread:$0]  %s17_s22, 256, %s19_s26, [#allocation3], %s267_s23, %s267_s23, %s268_s24  }
   0x9   :  { %s44_s29 = sshll.u32 %s270_s0, 4  ;;  %s271_s30 = smov 64   ;;  %s45_s29 = int_to_ptr.vmem [resolvable:$true] %s44_s29 }
   0xa   :  { %s272_s5 = smov 4  }
   0xb   :  { %50 = dma.hbm_to_vmem [thread:$0]  %s43_s1, 256, %s45_s29, [#allocation6], %s271_s30, %s271_s30, %s272_s5  }
   0xc   :  { %260 = dma.done.wait [#allocation3], 256  }
   0xd   :  { %261 = vsyncadd [#allocation3], 4294967040 }
   0xe   :  { %262 = dma.done.wait [#allocation6], 512  }
   0xf   :  { %263 = vsyncadd [#allocation6], 4294966784  ;;  %v153_v0 = vld [vmem:[#allocation7 + $0x8] sm:$0xff]  ;;  %v152_v1 = vld [vmem:[#allocation7] sm:$0xff]  ;;  %vm89_vm0 = vcmask 261120   ;;  %s273_s7 = smov 96  }
  0x10   :  { %99 = vmatpush.bf16.msra.mxu0 %v153_v0  ;;  %v66_v2 = vld [vmem:[#allocation5] sm:$0xff]  ;;  %v67_v3 = vld [vmem:[#allocation5 + $0x8] sm:$0xff]  ;;  %v163_v5 = vld [vmem:[%s330_s3] ss:$0 sm:$0xff]  ;;  %s274_s8 = smov [#allocation8]   ;;  %s129_s3 = sshll.u32 %s331_s4, 4  ;;  %s130_s3 = int_to_ptr.hbm [resolvable:$true] %s129_s3 }
  0x11   :  { %v68_v4 = vpack.c.bf16 %v67_v3, %v66_v2  ;;  %v107_v10 = vld [vmem:[#allocation2] sm:$0xff]  ;;  %v108_v14 = vld [vmem:[#allocation2 + $0x8] sm:$0xff]  ;;  %s127_s9 = sshll.u32 %s274_s8, 4  ;;  %s128_s9 = int_to_ptr.vmem [resolvable:$true] %s127_s9 }
  0x14   :  { %100 = vmatpush.bf16.msra.mxu0 %v152_v1 }
  0x17   :  { %151 = vmatmul.msk.bf16.vlgmr.msra.gmra.mxu0 %vm89_vm0, %v68_v4 }
  0x94   :  { %v102_v6 = vpop.f32.mrf.mxu0 }
  0x95   :  { %v103_v7 = vadd.f32 %v163_v5, %v102_v6 }
  0x97   :  { %113 = vrot.lane.b32.xlu0 %v103_v7, %s273_s7  ;;  %v109_v11 = vmul.f32 %v107_v10, %v103_v7 }
  0x9c   :  { %v104_v8 = vpop.f32.mrf.mxu0 }
  0x9d   :  { %v105_v9 = vadd.f32 %v163_v5, %v104_v8 }
  0x9f   :  { %115 = vrot.lane.b32.xlu0 %v105_v9, %s273_s7  ;;  %v110_v15 = vmul.f32 %v108_v14, %v105_v9 }
 0x109   :  { %v114_v12 = vpop.permute.xlu0 %113 }
 0x10a   :  { %v119_v13 = vadd.f32 %v114_v12, %v109_v11 }
 0x10c   :  { %121 = vst.msk [vmem:[#allocation8] sm:$0xff] %vm89_vm0, %v119_v13 }
 0x111   :  { %v116_v16 = vpop.permute.xlu0 %115 }
 0x112   :  { %v120_v17 = vadd.f32 %v116_v16, %v110_v15 }
 0x114   :  { %122 = vst.msk [vmem:[#allocation8 + $0x8] sm:$0xff] %vm89_vm0, %v120_v17 }
 0x115   :  { %135 = dma.vmem_to_hbm [thread:$0]  %s128_s9, 256, %s130_s3, [#allocation4], %s267_s23, %s267_s23, %s268_s24  }
 0x116   :  { %264 = dma.done.wait [#allocation4], 256  }
 0x117   :  { %265 = vsyncadd [#allocation4], 4294967040 }
 0x118   :  { %140 = vsyncpa [#allocation3], 1 }
 0x119   :  { %141 = vsyncpa [#allocation6], 1 }
 0x11a   :  { %142 = vsyncpa [#allocation4], 1 }

</bundles_post_ra>
